<compile_context>
chip_gen: v5e
topology: v5e:2x2
jax: 0.10.0
libtpu: 0.0.40
codegen_flags: <defaults>
</compile_context>

<pallas_src>
import math

import jax
import jax.numpy as jnp
import numpy as np
from jax import lax
from jax.experimental import pallas as pl
from jax.experimental.pallas import tpu as pltpu

# ----- small, deterministic problem sizes (consistent with GPT2 block shapes) -----
B, T, D = 2, 8, 32            # batch, sequence, n_embd
H = 4                         # num heads
HD = D // H                   # head dim
INNER = 4 * D                 # n_inner
EPS = 1e-5                    # layer_norm_epsilon
NEG_BIAS = -1e9               # finite additive causal mask
BT = B * T


def _layernorm(x, g, b):
    mu = jnp.mean(x, axis=-1, keepdims=True)
    var = jnp.mean((x - mu) ** 2, axis=-1, keepdims=True)
    return (x - mu) * lax.rsqrt(var + EPS) * g + b


def _gelu_new(x):
    # GPT2 "gelu_new": 0.5*x*(1+tanh(sqrt(2/pi)*(x+0.044715*x^3)))
    return 0.5 * x * (1.0 + jnp.tanh(
        math.sqrt(2.0 / math.pi) * (x + 0.044715 * x * x * x)))


def gpt2_block_kernel(h_ref, ln1g_ref, ln1b_ref, wqkv_ref, bqkv_ref,
                      wattn_ref, battn_ref, ln2g_ref, ln2b_ref,
                      wfc_ref, bfc_ref, wmlp_ref, bmlp_ref, out_ref):
    # Whole tensor in VMEM; flatten rows so every projection is a single 2-D matmul.
    x = h_ref[...].reshape(BT, D)                              # (B*T, D) f32

    # ---------------- ln_1 + fused QKV projection ----------------
    a = _layernorm(x, ln1g_ref[...], ln1b_ref[...])            # f32
    qkv = jnp.dot(a.astype(jnp.bfloat16), wqkv_ref[...],       # bf16 x bf16 -> f32
                  preferred_element_type=jnp.float32) + bqkv_ref[...]   # (B*T, 3D)

    inv_sqrt_hd = 1.0 / math.sqrt(HD)
    q = (qkv[:, 0:D] * inv_sqrt_hd)                            # fold 1/sqrt(hd) into q
    k = qkv[:, D:2 * D]
    v = qkv[:, 2 * D:3 * D]

    qb = q.reshape(B, T, D).astype(jnp.bfloat16)
    kb = k.reshape(B, T, D).astype(jnp.bfloat16)
    vb = v.reshape(B, T, D).astype(jnp.bfloat16)

    # Additive causal bias, computed once (not per head).
    rows = lax.broadcasted_iota(jnp.int32, (T, T), 0)
    cols = lax.broadcasted_iota(jnp.int32, (T, T), 1)
    causal_bias = jnp.where(rows >= cols,
                            jnp.float32(0.0), jnp.float32(NEG_BIAS))    # (T, T)

    # Per-head static loop; each head handles ALL batches in one batched einsum.
    ctx_parts = []
    for hh in range(H):
        sl = slice(hh * HD, (hh + 1) * HD)
        qh, kh, vh = qb[:, :, sl], kb[:, :, sl], vb[:, :, sl]  # (B, T, HD) bf16
        s = jnp.einsum("bqd,bkd->bqk", qh, kh,
                       preferred_element_type=jnp.float32)     # (B, T, T) f32
        s = s + causal_bias
        s = s - jnp.max(s, axis=-1, keepdims=True)
        p = jnp.exp(s)
        inv_l = pl.reciprocal(jnp.sum(p, axis=-1, keepdims=True), approx=True)
        p = p * inv_l
        ctx_parts.append(jnp.einsum("bqk,bkd->bqd", p.astype(jnp.bfloat16), vh,
                                    preferred_element_type=jnp.float32))
    ctx = jnp.concatenate(ctx_parts, axis=-1).reshape(BT, D)   # merged heads, f32

    # ---------------- attention output projection + residual ----------------
    attn_out = jnp.dot(ctx.astype(jnp.bfloat16), wattn_ref[...],
                       preferred_element_type=jnp.float32) + battn_ref[...]
    h1 = attn_out + x                                          # first residual

    # ---------------- ln_2 + MLP ----------------
    a2 = _layernorm(h1, ln2g_ref[...], ln2b_ref[...])
    ff = jnp.dot(a2.astype(jnp.bfloat16), wfc_ref[...],
                 preferred_element_type=jnp.float32) + bfc_ref[...]     # (B*T, INNER)
    ff = _gelu_new(ff)                                         # f32 elementwise
    ff = jnp.dot(ff.astype(jnp.bfloat16), wmlp_ref[...],
                 preferred_element_type=jnp.float32) + bmlp_ref[...]    # (B*T, D)

    out_ref[...] = (h1 + ff).reshape(B, T, D)                  # second residual


def dual_gpt2_block(hidden_states, params):
    # Projection weights go to HBM/VMEM in bf16 (halves weight DMA + VMEM);
    # LN params and biases stay f32.
    args = (
        hidden_states,
        params["ln1_g"], params["ln1_b"],
        params["w_qkv"].astype(jnp.bfloat16), params["b_qkv"],
        params["w_attn"].astype(jnp.bfloat16), params["b_attn"],
        params["ln2_g"], params["ln2_b"],
        params["w_fc"].astype(jnp.bfloat16), params["b_fc"],
        params["w_mlp"].astype(jnp.bfloat16), params["b_mlp"],
    )

    flops = (2 * BT * D * 3 * D          # qkv projection
             + 2 * B * H * T * T * HD    # q @ k^T
             + 2 * B * H * T * T * HD    # p @ v
             + 2 * BT * D * D            # attn output projection
             + 2 * BT * D * INNER        # mlp fc
             + 2 * BT * INNER * D)       # mlp proj
    transcendentals = (B * H * T * T     # exp
                       + BT * INNER      # tanh (gelu_new)
                       + 2 * BT          # rsqrt (two layernorms)
                       + B * H * T)      # softmax reciprocal
    bytes_accessed = int(sum(a.size * a.dtype.itemsize for a in args)
                         + hidden_states.size * hidden_states.dtype.itemsize)

    return pl.pallas_call(
        gpt2_block_kernel,
        out_shape=jax.ShapeDtypeStruct(hidden_states.shape, hidden_states.dtype),
        cost_estimate=pl.CostEstimate(flops=flops,
                                      transcendentals=transcendentals,
                                      bytes_accessed=bytes_accessed),
        compiler_params=pltpu.CompilerParams(vmem_limit_bytes=32 * 1024 * 1024),
    )(*args)


# ---------------- pure-JAX reference (identical math / precision) ----------------
def reference(h, p):
    inv_sqrt_hd = 1.0 / math.sqrt(HD)

    def ln(x, g, b):
        mu = x.mean(-1, keepdims=True)
        var = ((x - mu) ** 2).mean(-1, keepdims=True)
        return (x - mu) * lax.rsqrt(var + EPS) * g + b

    x = h.reshape(BT, D)
    a = ln(x, p["ln1_g"], p["ln1_b"])
    qkv = (jnp.dot(a.astype(jnp.bfloat16), p["w_qkv"].astype(jnp.bfloat16),
                   preferred_element_type=jnp.float32) + p["b_qkv"])
    q = (qkv[:, :D] * inv_sqrt_hd).astype(jnp.bfloat16).reshape(B, T, H, HD)
    k = qkv[:, D:2 * D].astype(jnp.bfloat16).reshape(B, T, H, HD)
    v = qkv[:, 2 * D:].astype(jnp.bfloat16).reshape(B, T, H, HD)
    s = jnp.einsum("bqhd,bkhd->bhqk", q, k, preferred_element_type=jnp.float32)
    mask = jnp.tril(jnp.ones((T, T), bool))
    s = s + jnp.where(mask, jnp.float32(0.0), jnp.float32(NEG_BIAS))
    pa = jax.nn.softmax(s, axis=-1).astype(jnp.bfloat16)
    ctx = jnp.einsum("bhqk,bkhd->bqhd", pa, v,
                     preferred_element_type=jnp.float32).reshape(BT, D)
    attn_out = (jnp.dot(ctx.astype(jnp.bfloat16), p["w_attn"].astype(jnp.bfloat16),
                        preferred_element_type=jnp.float32) + p["b_attn"])
    h1 = attn_out + x
    a2 = ln(h1, p["ln2_g"], p["ln2_b"])
    ff = (jnp.dot(a2.astype(jnp.bfloat16), p["w_fc"].astype(jnp.bfloat16),
                  preferred_element_type=jnp.float32) + p["b_fc"])
    ff = _gelu_new(ff)
    ff = (jnp.dot(ff.astype(jnp.bfloat16), p["w_mlp"].astype(jnp.bfloat16),
                  preferred_element_type=jnp.float32) + p["b_mlp"])
    return (h1 + ff).reshape(B, T, D)


def init_params(key):
    ks = jax.random.split(key, 8)
    n = lambda k, shape, s=0.02: (s * jax.random.normal(k, shape)).astype(jnp.float32)
    return {
        "ln1_g": jnp.ones((1, D), jnp.float32),
        "ln1_b": jnp.zeros((1, D), jnp.float32),
        "w_qkv": n(ks[0], (D, 3 * D)),
        "b_qkv": n(ks[1], (1, 3 * D)),
        "w_attn": n(ks[2], (D, D)),
        "b_attn": n(ks[3], (1, D)),
        "ln2_g": jnp.ones((1, D), jnp.float32),
        "ln2_b": jnp.zeros((1, D), jnp.float32),
        "w_fc": n(ks[4], (D, INNER)),
        "b_fc": n(ks[5], (1, INNER)),
        "w_mlp": n(ks[6], (INNER, D)),
        "b_mlp": n(ks[7], (1, D)),
    }


if __name__ == "__main__":
    root = jax.random.PRNGKey(0)
    k_h, k_p = jax.random.split(root)
    hidden_states = jax.random.normal(k_h, (B, T, D), jnp.float32)
    params = init_params(k_p)

    out = jax.block_until_ready(dual_gpt2_block(hidden_states, params))
    ref = jax.block_until_ready(reference(hidden_states, params))

    assert out.shape == (B, T, D) and out.dtype == jnp.float32
    assert np.allclose(np.asarray(out), np.asarray(ref), rtol=2e-3, atol=2e-3), (
        "Pallas output mismatch vs JAX reference")
    print("KERNEL_OK")
</pallas_src>

<mosaic_0001>
module attributes {stable_mosaic.version = 11 : i64} {
  func.func @gpt2_block_kernel(%arg0: memref<2x8x32xf32, #tpu.memory_space<vmem>>, %arg1: memref<1x32xf32, #tpu.memory_space<vmem>>, %arg2: memref<1x32xf32, #tpu.memory_space<vmem>>, %arg3: memref<32x96xbf16, #tpu.memory_space<vmem>>, %arg4: memref<1x96xf32, #tpu.memory_space<vmem>>, %arg5: memref<32x32xbf16, #tpu.memory_space<vmem>>, %arg6: memref<1x32xf32, #tpu.memory_space<vmem>>, %arg7: memref<1x32xf32, #tpu.memory_space<vmem>>, %arg8: memref<1x32xf32, #tpu.memory_space<vmem>>, %arg9: memref<32x128xbf16, #tpu.memory_space<vmem>>, %arg10: memref<1x128xf32, #tpu.memory_space<vmem>>, %arg11: memref<128x32xbf16, #tpu.memory_space<vmem>>, %arg12: memref<1x32xf32, #tpu.memory_space<vmem>>, %arg13: memref<2x8x32xf32, #tpu.memory_space<vmem>>) attributes {dimension_semantics = [], scalar_prefetch = 0 : i64, scratch_operands = 0 : i64, tpu.core_type = #tpu.core_type<tc>} {
    %c0 = arith.constant 0 : index
    %c0_0 = arith.constant 0 : index
    %c0_1 = arith.constant 0 : index
    %0 = vector.load %arg0[%c0, %c0_0, %c0_1] : memref<2x8x32xf32, #tpu.memory_space<vmem>>, vector<2x8x32xf32>
    %1 = vector.shape_cast %0 : vector<2x8x32xf32> to vector<16x32xf32>
    %c0_2 = arith.constant 0 : index
    %c0_3 = arith.constant 0 : index
    %2 = vector.load %arg1[%c0_2, %c0_3] : memref<1x32xf32, #tpu.memory_space<vmem>>, vector<1x32xf32>
    %c0_4 = arith.constant 0 : index
    %c0_5 = arith.constant 0 : index
    %3 = vector.load %arg2[%c0_4, %c0_5] : memref<1x32xf32, #tpu.memory_space<vmem>>, vector<1x32xf32>
    %cst = arith.constant dense<0.000000e+00> : vector<16xf32>
    %4 = vector.multi_reduction <add>, %1, %cst [1] : vector<16x32xf32> to vector<16xf32>
    %5 = vector.shape_cast %4 : vector<16xf32> to vector<16x1xf32>
    %cst_6 = arith.constant 3.200000e+01 : f32
    %6 = vector.broadcast %cst_6 : f32 to vector<16x1xf32>
    %7 = arith.divf %5, %6 : vector<16x1xf32>
    %8 = vector.broadcast %7 : vector<16x1xf32> to vector<16x32xf32>
    %9 = arith.subf %1, %8 : vector<16x32xf32>
    %10 = arith.mulf %9, %9 : vector<16x32xf32>
    %cst_7 = arith.constant dense<0.000000e+00> : vector<16xf32>
    %11 = vector.multi_reduction <add>, %10, %cst_7 [1] : vector<16x32xf32> to vector<16xf32>
    %12 = vector.shape_cast %11 : vector<16xf32> to vector<16x1xf32>
    %cst_8 = arith.constant 3.200000e+01 : f32
    %13 = vector.broadcast %cst_8 : f32 to vector<16x1xf32>
    %14 = arith.divf %12, %13 : vector<16x1xf32>
    %15 = vector.broadcast %7 : vector<16x1xf32> to vector<16x32xf32>
    %16 = arith.subf %1, %15 : vector<16x32xf32>
    %cst_9 = arith.constant 9.99999974E-6 : f32
    %17 = vector.broadcast %cst_9 : f32 to vector<16x1xf32>
    %18 = arith.addf %14, %17 : vector<16x1xf32>
    %19 = math.rsqrt %18 : vector<16x1xf32>
    %20 = vector.broadcast %19 : vector<16x1xf32> to vector<16x32xf32>
    %21 = arith.mulf %16, %20 : vector<16x32xf32>
    %22 = vector.broadcast %2 : vector<1x32xf32> to vector<16x32xf32>
    %23 = arith.mulf %21, %22 : vector<16x32xf32>
    %24 = vector.broadcast %3 : vector<1x32xf32> to vector<16x32xf32>
    %25 = arith.addf %23, %24 : vector<16x32xf32>
    %26 = arith.truncf %25 : vector<16x32xf32> to vector<16x32xbf16>
    %c0_10 = arith.constant 0 : index
    %c0_11 = arith.constant 0 : index
    %27 = vector.load %arg3[%c0_10, %c0_11] : memref<32x96xbf16, #tpu.memory_space<vmem>>, vector<32x96xbf16>
    %cst_12 = arith.constant dense<0.000000e+00> : vector<16x96xf32>
    %28 = tpu.matmul %26, %27, %cst_12 {dimension_numbers = #tpu.dot_dimension_numbers<[1], [0], [0], [1], [0, 0, 1, 1], [], []>} : vector<16x32xbf16>, vector<32x96xbf16>, vector<16x96xf32> -> vector<16x96xf32>
    %c0_13 = arith.constant 0 : index
    %c0_14 = arith.constant 0 : index
    %29 = vector.load %arg4[%c0_13, %c0_14] : memref<1x96xf32, #tpu.memory_space<vmem>>, vector<1x96xf32>
    %30 = vector.broadcast %29 : vector<1x96xf32> to vector<16x96xf32>
    %31 = arith.addf %28, %30 : vector<16x96xf32>
    %32 = vector.extract_strided_slice %31 {offsets = [0, 0], sizes = [16, 32], strides = [1, 1]} : vector<16x96xf32> to vector<16x32xf32>
    %cst_15 = arith.constant 0.353553385 : f32
    %33 = vector.broadcast %cst_15 : f32 to vector<16x32xf32>
    %34 = arith.mulf %32, %33 : vector<16x32xf32>
    %35 = vector.extract_strided_slice %31 {offsets = [0, 32], sizes = [16, 32], strides = [1, 1]} : vector<16x96xf32> to vector<16x32xf32>
    %36 = vector.extract_strided_slice %31 {offsets = [0, 64], sizes = [16, 32], strides = [1, 1]} : vector<16x96xf32> to vector<16x32xf32>
    %37 = vector.shape_cast %34 : vector<16x32xf32> to vector<2x8x32xf32>
    %38 = arith.truncf %37 : vector<2x8x32xf32> to vector<2x8x32xbf16>
    %39 = vector.shape_cast %35 : vector<16x32xf32> to vector<2x8x32xf32>
    %40 = arith.truncf %39 : vector<2x8x32xf32> to vector<2x8x32xbf16>
    %41 = vector.shape_cast %36 : vector<16x32xf32> to vector<2x8x32xf32>
    %42 = arith.truncf %41 : vector<2x8x32xf32> to vector<2x8x32xbf16>
    %43 = tpu.iota {dimensions = array<i32: 0>} : vector<8x8xi32>
    %44 = tpu.iota {dimensions = array<i32: 1>} : vector<8x8xi32>
    %45 = arith.cmpi sge, %43, %44 : vector<8x8xi32>
    %cst_16 = arith.constant 0.000000e+00 : f32
    %cst_17 = arith.constant -1.000000e+09 : f32
    %46 = vector.broadcast %cst_16 : f32 to vector<8x8xf32>
    %47 = vector.broadcast %cst_17 : f32 to vector<8x8xf32>
    %48 = arith.select %45, %46, %47 : vector<8x8xi1>, vector<8x8xf32>
    %49 = vector.extract_strided_slice %38 {offsets = [0, 0, 0], sizes = [2, 8, 8], strides = [1, 1, 1]} : vector<2x8x32xbf16> to vector<2x8x8xbf16>
    %50 = vector.extract_strided_slice %40 {offsets = [0, 0, 0], sizes = [2, 8, 8], strides = [1, 1, 1]} : vector<2x8x32xbf16> to vector<2x8x8xbf16>
    %51 = vector.extract_strided_slice %42 {offsets = [0, 0, 0], sizes = [2, 8, 8], strides = [1, 1, 1]} : vector<2x8x32xbf16> to vector<2x8x8xbf16>
    "tpu.trace_start"() <{level = 10 : i32, message = "bqd,bkd->bqk"}> : () -> ()
    %cst_18 = arith.constant dense<0.000000e+00> : vector<2x8x8xf32>
    %52 = tpu.matmul %49, %50, %cst_18 {dimension_numbers = #tpu.dot_dimension_numbers<[2], [2], [1], [1], [0, 0, 0, 1, 1, 1], [0], [0]>} : vector<2x8x8xbf16>, vector<2x8x8xbf16>, vector<2x8x8xf32> -> vector<2x8x8xf32>
    "tpu.trace_stop"() : () -> ()
    %53 = vector.shape_cast %48 : vector<8x8xf32> to vector<1x8x8xf32>
    %54 = vector.broadcast %53 : vector<1x8x8xf32> to vector<2x8x8xf32>
    %55 = arith.addf %52, %54 : vector<2x8x8xf32>
    %cst_19 = arith.constant dense<0xFF800000> : vector<2x8xf32>
    %56 = vector.multi_reduction <maximumf>, %55, %cst_19 [2] : vector<2x8x8xf32> to vector<2x8xf32>
    %57 = vector.shape_cast %56 : vector<2x8xf32> to vector<2x8x1xf32>
    %58 = vector.broadcast %57 : vector<2x8x1xf32> to vector<2x8x8xf32>
    %59 = arith.subf %55, %58 : vector<2x8x8xf32>
    %60 = math.exp %59 : vector<2x8x8xf32>
    %cst_20 = arith.constant dense<0.000000e+00> : vector<2x8xf32>
    %61 = vector.multi_reduction <add>, %60, %cst_20 [2] : vector<2x8x8xf32> to vector<2x8xf32>
    %62 = vector.shape_cast %61 : vector<2x8xf32> to vector<2x8x1xf32>
    %63 = tpu.reciprocal %62 {approx = true} : vector<2x8x1xf32> -> vector<2x8x1xf32>
    %64 = vector.broadcast %63 : vector<2x8x1xf32> to vector<2x8x8xf32>
    %65 = arith.mulf %60, %64 : vector<2x8x8xf32>
    %66 = arith.truncf %65 : vector<2x8x8xf32> to vector<2x8x8xbf16>
    "tpu.trace_start"() <{level = 10 : i32, message = "bqk,bkd->bqd"}> : () -> ()
    %cst_21 = arith.constant dense<0.000000e+00> : vector<2x8x8xf32>
    %67 = tpu.matmul %66, %51, %cst_21 {dimension_numbers = #tpu.dot_dimension_numbers<[2], [1], [1], [2], [0, 0, 0, 1, 1, 2], [0], [0]>} : vector<2x8x8xbf16>, vector<2x8x8xbf16>, vector<2x8x8xf32> -> vector<2x8x8xf32>
    "tpu.trace_stop"() : () -> ()
    %68 = vector.extract_strided_slice %38 {offsets = [0, 0, 8], sizes = [2, 8, 8], strides = [1, 1, 1]} : vector<2x8x32xbf16> to vector<2x8x8xbf16>
    %69 = vector.extract_strided_slice %40 {offsets = [0, 0, 8], sizes = [2, 8, 8], strides = [1, 1, 1]} : vector<2x8x32xbf16> to vector<2x8x8xbf16>
    %70 = vector.extract_strided_slice %42 {offsets = [0, 0, 8], sizes = [2, 8, 8], strides = [1, 1, 1]} : vector<2x8x32xbf16> to vector<2x8x8xbf16>
    "tpu.trace_start"() <{level = 10 : i32, message = "bqd,bkd->bqk"}> : () -> ()
    %cst_22 = arith.constant dense<0.000000e+00> : vector<2x8x8xf32>
    %71 = tpu.matmul %68, %69, %cst_22 {dimension_numbers = #tpu.dot_dimension_numbers<[2], [2], [1], [1], [0, 0, 0, 1, 1, 1], [0], [0]>} : vector<2x8x8xbf16>, vector<2x8x8xbf16>, vector<2x8x8xf32> -> vector<2x8x8xf32>
    "tpu.trace_stop"() : () -> ()
    %72 = vector.shape_cast %48 : vector<8x8xf32> to vector<1x8x8xf32>
    %73 = vector.broadcast %72 : vector<1x8x8xf32> to vector<2x8x8xf32>
    %74 = arith.addf %71, %73 : vector<2x8x8xf32>
    %cst_23 = arith.constant dense<0xFF800000> : vector<2x8xf32>
    %75 = vector.multi_reduction <maximumf>, %74, %cst_23 [2] : vector<2x8x8xf32> to vector<2x8xf32>
    %76 = vector.shape_cast %75 : vector<2x8xf32> to vector<2x8x1xf32>
    %77 = vector.broadcast %76 : vector<2x8x1xf32> to vector<2x8x8xf32>
    %78 = arith.subf %74, %77 : vector<2x8x8xf32>
    %79 = math.exp %78 : vector<2x8x8xf32>
    %cst_24 = arith.constant dense<0.000000e+00> : vector<2x8xf32>
    %80 = vector.multi_reduction <add>, %79, %cst_24 [2] : vector<2x8x8xf32> to vector<2x8xf32>
    %81 = vector.shape_cast %80 : vector<2x8xf32> to vector<2x8x1xf32>
    %82 = tpu.reciprocal %81 {approx = true} : vector<2x8x1xf32> -> vector<2x8x1xf32>
    %83 = vector.broadcast %82 : vector<2x8x1xf32> to vector<2x8x8xf32>
    %84 = arith.mulf %79, %83 : vector<2x8x8xf32>
    %85 = arith.truncf %84 : vector<2x8x8xf32> to vector<2x8x8xbf16>
    "tpu.trace_start"() <{level = 10 : i32, message = "bqk,bkd->bqd"}> : () -> ()
    %cst_25 = arith.constant dense<0.000000e+00> : vector<2x8x8xf32>
    %86 = tpu.matmul %85, %70, %cst_25 {dimension_numbers = #tpu.dot_dimension_numbers<[2], [1], [1], [2], [0, 0, 0, 1, 1, 2], [0], [0]>} : vector<2x8x8xbf16>, vector<2x8x8xbf16>, vector<2x8x8xf32> -> vector<2x8x8xf32>
    "tpu.trace_stop"() : () -> ()
    %87 = vector.extract_strided_slice %38 {offsets = [0, 0, 16], sizes = [2, 8, 8], strides = [1, 1, 1]} : vector<2x8x32xbf16> to vector<2x8x8xbf16>
    %88 = vector.extract_strided_slice %40 {offsets = [0, 0, 16], sizes = [2, 8, 8], strides = [1, 1, 1]} : vector<2x8x32xbf16> to vector<2x8x8xbf16>
    %89 = vector.extract_strided_slice %42 {offsets = [0, 0, 16], sizes = [2, 8, 8], strides = [1, 1, 1]} : vector<2x8x32xbf16> to vector<2x8x8xbf16>
    "tpu.trace_start"() <{level = 10 : i32, message = "bqd,bkd->bqk"}> : () -> ()
    %cst_26 = arith.constant dense<0.000000e+00> : vector<2x8x8xf32>
    %90 = tpu.matmul %87, %88, %cst_26 {dimension_numbers = #tpu.dot_dimension_numbers<[2], [2], [1], [1], [0, 0, 0, 1, 1, 1], [0], [0]>} : vector<2x8x8xbf16>, vector<2x8x8xbf16>, vector<2x8x8xf32> -> vector<2x8x8xf32>
    "tpu.trace_stop"() : () -> ()
    %91 = vector.shape_cast %48 : vector<8x8xf32> to vector<1x8x8xf32>
    %92 = vector.broadcast %91 : vector<1x8x8xf32> to vector<2x8x8xf32>
    %93 = arith.addf %90, %92 : vector<2x8x8xf32>
    %cst_27 = arith.constant dense<0xFF800000> : vector<2x8xf32>
    %94 = vector.multi_reduction <maximumf>, %93, %cst_27 [2] : vector<2x8x8xf32> to vector<2x8xf32>
    %95 = vector.shape_cast %94 : vector<2x8xf32> to vector<2x8x1xf32>
    %96 = vector.broadcast %95 : vector<2x8x1xf32> to vector<2x8x8xf32>
    %97 = arith.subf %93, %96 : vector<2x8x8xf32>
    %98 = math.exp %97 : vector<2x8x8xf32>
    %cst_28 = arith.constant dense<0.000000e+00> : vector<2x8xf32>
    %99 = vector.multi_reduction <add>, %98, %cst_28 [2] : vector<2x8x8xf32> to vector<2x8xf32>
    %100 = vector.shape_cast %99 : vector<2x8xf32> to vector<2x8x1xf32>
    %101 = tpu.reciprocal %100 {approx = true} : vector<2x8x1xf32> -> vector<2x8x1xf32>
    %102 = vector.broadcast %101 : vector<2x8x1xf32> to vector<2x8x8xf32>
    %103 = arith.mulf %98, %102 : vector<2x8x8xf32>
    %104 = arith.truncf %103 : vector<2x8x8xf32> to vector<2x8x8xbf16>
    "tpu.trace_start"() <{level = 10 : i32, message = "bqk,bkd->bqd"}> : () -> ()
    %cst_29 = arith.constant dense<0.000000e+00> : vector<2x8x8xf32>
    %105 = tpu.matmul %104, %89, %cst_29 {dimension_numbers = #tpu.dot_dimension_numbers<[2], [1], [1], [2], [0, 0, 0, 1, 1, 2], [0], [0]>} : vector<2x8x8xbf16>, vector<2x8x8xbf16>, vector<2x8x8xf32> -> vector<2x8x8xf32>
    "tpu.trace_stop"() : () -> ()
    %106 = vector.extract_strided_slice %38 {offsets = [0, 0, 24], sizes = [2, 8, 8], strides = [1, 1, 1]} : vector<2x8x32xbf16> to vector<2x8x8xbf16>
    %107 = vector.extract_strided_slice %40 {offsets = [0, 0, 24], sizes = [2, 8, 8], strides = [1, 1, 1]} : vector<2x8x32xbf16> to vector<2x8x8xbf16>
    %108 = vector.extract_strided_slice %42 {offsets = [0, 0, 24], sizes = [2, 8, 8], strides = [1, 1, 1]} : vector<2x8x32xbf16> to vector<2x8x8xbf16>
    "tpu.trace_start"() <{level = 10 : i32, message = "bqd,bkd->bqk"}> : () -> ()
    %cst_30 = arith.constant dense<0.000000e+00> : vector<2x8x8xf32>
    %109 = tpu.matmul %106, %107, %cst_30 {dimension_numbers = #tpu.dot_dimension_numbers<[2], [2], [1], [1], [0, 0, 0, 1, 1, 1], [0], [0]>} : vector<2x8x8xbf16>, vector<2x8x8xbf16>, vector<2x8x8xf32> -> vector<2x8x8xf32>
    "tpu.trace_stop"() : () -> ()
    %110 = vector.shape_cast %48 : vector<8x8xf32> to vector<1x8x8xf32>
    %111 = vector.broadcast %110 : vector<1x8x8xf32> to vector<2x8x8xf32>
    %112 = arith.addf %109, %111 : vector<2x8x8xf32>
    %cst_31 = arith.constant dense<0xFF800000> : vector<2x8xf32>
    %113 = vector.multi_reduction <maximumf>, %112, %cst_31 [2] : vector<2x8x8xf32> to vector<2x8xf32>
    %114 = vector.shape_cast %113 : vector<2x8xf32> to vector<2x8x1xf32>
    %115 = vector.broadcast %114 : vector<2x8x1xf32> to vector<2x8x8xf32>
    %116 = arith.subf %112, %115 : vector<2x8x8xf32>
    %117 = math.exp %116 : vector<2x8x8xf32>
    %cst_32 = arith.constant dense<0.000000e+00> : vector<2x8xf32>
    %118 = vector.multi_reduction <add>, %117, %cst_32 [2] : vector<2x8x8xf32> to vector<2x8xf32>
    %119 = vector.shape_cast %118 : vector<2x8xf32> to vector<2x8x1xf32>
    %120 = tpu.reciprocal %119 {approx = true} : vector<2x8x1xf32> -> vector<2x8x1xf32>
    %121 = vector.broadcast %120 : vector<2x8x1xf32> to vector<2x8x8xf32>
    %122 = arith.mulf %117, %121 : vector<2x8x8xf32>
    %123 = arith.truncf %122 : vector<2x8x8xf32> to vector<2x8x8xbf16>
    "tpu.trace_start"() <{level = 10 : i32, message = "bqk,bkd->bqd"}> : () -> ()
    %cst_33 = arith.constant dense<0.000000e+00> : vector<2x8x8xf32>
    %124 = tpu.matmul %123, %108, %cst_33 {dimension_numbers = #tpu.dot_dimension_numbers<[2], [1], [1], [2], [0, 0, 0, 1, 1, 2], [0], [0]>} : vector<2x8x8xbf16>, vector<2x8x8xbf16>, vector<2x8x8xf32> -> vector<2x8x8xf32>
    "tpu.trace_stop"() : () -> ()
    %125 = tpu.concatenate %67, %86, %105, %124 in 2 : vector<2x8x8xf32>, vector<2x8x8xf32>, vector<2x8x8xf32>, vector<2x8x8xf32> -> vector<2x8x32xf32>
    %126 = vector.shape_cast %125 : vector<2x8x32xf32> to vector<16x32xf32>
    %127 = arith.truncf %126 : vector<16x32xf32> to vector<16x32xbf16>
    %c0_34 = arith.constant 0 : index
    %c0_35 = arith.constant 0 : index
    %128 = vector.load %arg5[%c0_34, %c0_35] : memref<32x32xbf16, #tpu.memory_space<vmem>>, vector<32x32xbf16>
    %cst_36 = arith.constant dense<0.000000e+00> : vector<16x32xf32>
    %129 = tpu.matmul %127, %128, %cst_36 {dimension_numbers = #tpu.dot_dimension_numbers<[1], [0], [0], [1], [0, 0, 1, 1], [], []>} : vector<16x32xbf16>, vector<32x32xbf16>, vector<16x32xf32> -> vector<16x32xf32>
    %c0_37 = arith.constant 0 : index
    %c0_38 = arith.constant 0 : index
    %130 = vector.load %arg6[%c0_37, %c0_38] : memref<1x32xf32, #tpu.memory_space<vmem>>, vector<1x32xf32>
    %131 = vector.broadcast %130 : vector<1x32xf32> to vector<16x32xf32>
    %132 = arith.addf %129, %131 : vector<16x32xf32>
    %133 = arith.addf %132, %1 : vector<16x32xf32>
    %c0_39 = arith.constant 0 : index
    %c0_40 = arith.constant 0 : index
    %134 = vector.load %arg7[%c0_39, %c0_40] : memref<1x32xf32, #tpu.memory_space<vmem>>, vector<1x32xf32>
    %c0_41 = arith.constant 0 : index
    %c0_42 = arith.constant 0 : index
    %135 = vector.load %arg8[%c0_41, %c0_42] : memref<1x32xf32, #tpu.memory_space<vmem>>, vector<1x32xf32>
    %cst_43 = arith.constant dense<0.000000e+00> : vector<16xf32>
    %136 = vector.multi_reduction <add>, %133, %cst_43 [1] : vector<16x32xf32> to vector<16xf32>
    %137 = vector.shape_cast %136 : vector<16xf32> to vector<16x1xf32>
    %cst_44 = arith.constant 3.200000e+01 : f32
    %138 = vector.broadcast %cst_44 : f32 to vector<16x1xf32>
    %139 = arith.divf %137, %138 : vector<16x1xf32>
    %140 = vector.broadcast %139 : vector<16x1xf32> to vector<16x32xf32>
    %141 = arith.subf %133, %140 : vector<16x32xf32>
    %142 = arith.mulf %141, %141 : vector<16x32xf32>
    %cst_45 = arith.constant dense<0.000000e+00> : vector<16xf32>
    %143 = vector.multi_reduction <add>, %142, %cst_45 [1] : vector<16x32xf32> to vector<16xf32>
    %144 = vector.shape_cast %143 : vector<16xf32> to vector<16x1xf32>
    %cst_46 = arith.constant 3.200000e+01 : f32
    %145 = vector.broadcast %cst_46 : f32 to vector<16x1xf32>
    %146 = arith.divf %144, %145 : vector<16x1xf32>
    %147 = vector.broadcast %139 : vector<16x1xf32> to vector<16x32xf32>
    %148 = arith.subf %133, %147 : vector<16x32xf32>
    %cst_47 = arith.constant 9.99999974E-6 : f32
    %149 = vector.broadcast %cst_47 : f32 to vector<16x1xf32>
    %150 = arith.addf %146, %149 : vector<16x1xf32>
    %151 = math.rsqrt %150 : vector<16x1xf32>
    %152 = vector.broadcast %151 : vector<16x1xf32> to vector<16x32xf32>
    %153 = arith.mulf %148, %152 : vector<16x32xf32>
    %154 = vector.broadcast %134 : vector<1x32xf32> to vector<16x32xf32>
    %155 = arith.mulf %153, %154 : vector<16x32xf32>
    %156 = vector.broadcast %135 : vector<1x32xf32> to vector<16x32xf32>
    %157 = arith.addf %155, %156 : vector<16x32xf32>
    %158 = arith.truncf %157 : vector<16x32xf32> to vector<16x32xbf16>
    %c0_48 = arith.constant 0 : index
    %c0_49 = arith.constant 0 : index
    %159 = vector.load %arg9[%c0_48, %c0_49] : memref<32x128xbf16, #tpu.memory_space<vmem>>, vector<32x128xbf16>
    %cst_50 = arith.constant dense<0.000000e+00> : vector<16x128xf32>
    %160 = tpu.matmul %158, %159, %cst_50 {dimension_numbers = #tpu.dot_dimension_numbers<[1], [0], [0], [1], [0, 0, 1, 1], [], []>} : vector<16x32xbf16>, vector<32x128xbf16>, vector<16x128xf32> -> vector<16x128xf32>
    %c0_51 = arith.constant 0 : index
    %c0_52 = arith.constant 0 : index
    %161 = vector.load %arg10[%c0_51, %c0_52] : memref<1x128xf32, #tpu.memory_space<vmem>>, vector<1x128xf32>
    %162 = vector.broadcast %161 : vector<1x128xf32> to vector<16x128xf32>
    %163 = arith.addf %160, %162 : vector<16x128xf32>
    %cst_53 = arith.constant 5.000000e-01 : f32
    %164 = vector.broadcast %cst_53 : f32 to vector<16x128xf32>
    %165 = arith.mulf %164, %163 : vector<16x128xf32>
    %cst_54 = arith.constant 4.471500e-02 : f32
    %166 = vector.broadcast %cst_54 : f32 to vector<16x128xf32>
    %167 = arith.mulf %166, %163 : vector<16x128xf32>
    %168 = arith.mulf %167, %163 : vector<16x128xf32>
    %169 = arith.mulf %168, %163 : vector<16x128xf32>
    %170 = arith.addf %163, %169 : vector<16x128xf32>
    %cst_55 = arith.constant 0.797884583 : f32
    %171 = vector.broadcast %cst_55 : f32 to vector<16x128xf32>
    %172 = arith.mulf %171, %170 : vector<16x128xf32>
    %173 = math.tanh %172 : vector<16x128xf32>
    %cst_56 = arith.constant 1.000000e+00 : f32
    %174 = vector.broadcast %cst_56 : f32 to vector<16x128xf32>
    %175 = arith.addf %174, %173 : vector<16x128xf32>
    %176 = arith.mulf %165, %175 : vector<16x128xf32>
    %177 = arith.truncf %176 : vector<16x128xf32> to vector<16x128xbf16>
    %c0_57 = arith.constant 0 : index
    %c0_58 = arith.constant 0 : index
    %178 = vector.load %arg11[%c0_57, %c0_58] : memref<128x32xbf16, #tpu.memory_space<vmem>>, vector<128x32xbf16>
    %cst_59 = arith.constant dense<0.000000e+00> : vector<16x32xf32>
    %179 = tpu.matmul %177, %178, %cst_59 {dimension_numbers = #tpu.dot_dimension_numbers<[1], [0], [0], [1], [0, 0, 1, 1], [], []>} : vector<16x128xbf16>, vector<128x32xbf16>, vector<16x32xf32> -> vector<16x32xf32>
    %c0_60 = arith.constant 0 : index
    %c0_61 = arith.constant 0 : index
    %180 = vector.load %arg12[%c0_60, %c0_61] : memref<1x32xf32, #tpu.memory_space<vmem>>, vector<1x32xf32>
    %181 = vector.broadcast %180 : vector<1x32xf32> to vector<16x32xf32>
    %182 = arith.addf %179, %181 : vector<16x32xf32>
    %183 = arith.addf %133, %182 : vector<16x32xf32>
    %184 = vector.shape_cast %183 : vector<16x32xf32> to vector<2x8x32xf32>
    %c0_62 = arith.constant 0 : index
    %c0_63 = arith.constant 0 : index
    %c0_64 = arith.constant 0 : index
    %185 = vector.load %arg13[%c0_62, %c0_63, %c0_64] : memref<2x8x32xf32, #tpu.memory_space<vmem>>, vector<2x8x32xf32>
    tpu.vector_store %arg13[%c0_62, %c0_63, %c0_64], %184 {strides = array<i32>} : memref<2x8x32xf32, #tpu.memory_space<vmem>>, vector<2x8x32xf32>,
    return
  }
}

</mosaic_0001>

<bundles_post_ra>
// kernel: tpu_custom_call.1
= control target key start
LH: loop header
LB: loop body
LE: loop exit
PB: predicated region body
PF: predicated region fallthrough
CT: control target
= control target key end

     0   :  { %vm50_vm0 = vcmask 261120   ;;  %s1419_s0 = inlined_call_operand.vmem [shape: f32[2,8,32], index: 0, kind: input, shape index: {}]   ;;  %s1420_s1 = inlined_call_operand.vmem [shape: f32[1,32], index: 1, kind: input, shape index: {}]   ;;  %s1421_s2 = inlined_call_operand.vmem [shape: f32[1,32], index: 2, kind: input, shape index: {}]   ;;  %s1422_s3 = inlined_call_operand.vmem [shape: bf16[32,96], index: 3, kind: input, shape index: {}]   ;;  %s1423_s4 = inlined_call_operand.vmem [shape: f32[1,96], index: 4, kind: input, shape index: {}]   ;;  %s1424_s5 = inlined_call_operand.vmem [shape: bf16[32,32], index: 5, kind: input, shape index: {}]   ;;  %s1425_s6 = inlined_call_operand.vmem [shape: f32[1,32], index: 6, kind: input, shape index: {}]   ;;  %s1426_s7 = inlined_call_operand.vmem [shape: f32[1,32], index: 7, kind: input, shape index: {}]   ;;  %s1427_s8 = inlined_call_operand.vmem [shape: f32[1,32], index: 8, kind: input, shape index: {}]   ;;  %s1428_s9 = inlined_call_operand.vmem [shape: bf16[32,128], index: 9, kind: input, shape index: {}]   ;;  %s1429_s10 = inlined_call_operand.vmem [shape: f32[1,128], index: 10, kind: input, shape index: {}]   ;;  %s1430_s11 = inlined_call_operand.vmem [shape: bf16[128,32], index: 11, kind: input, shape index: {}]   ;;  %s1431_s12 = inlined_call_operand.vmem [shape: f32[1,32], index: 12, kind: input, shape index: {}]   ;;  %s1432_s13 = inlined_call_operand.hbm [shape: f32[2,8,32], index: 13, kind: output, shape index: {}]  }
   0x1   :  { %v1202_v0 = vld [vmem:[%s1419_s0] sm:$0xff] }
   0x2   :  { %v51_v1 = vsel %vm50_vm0, %v1202_v0, 0.0 }
   0x3   :  { %52 = vadd.xlane.f32.xlu0 %v51_v1 }
   0x4   :  { %18 = vsyncpa [#allocation3], 0  ;;  %v1209_v2 = vld [vmem:[%s1419_s0 + $0x8] sm:$0xff]  ;;  %v1111_v4 = vmov 32.0   ;;  %v984_v23 = vld [vmem:[%s1422_s3] sm:$0xff]  ;;  %s1115_s20 = smov 80  }
   0x5   :  { %v54_v3 = vsel %vm50_vm0, %v1209_v2, 0.0  ;;  %1039 = vrcp.f32 %v1111_v4  ;;  %v985_v21 = vld [vmem:[%s1422_s3 + $0x8] sm:$0xff]  ;;  %v1031_v42 = vld [vmem:[%s1420_s1] ss:$0 sm:$0xff]  ;;  %s1112_s1 = smov 88   ;;  %s1116_s21 = smov 112  }
   0x6   :  { %142 = vmatpush.bf16.msra.mxu0 %v985_v21  ;;  %v1032_v47 = vld [vmem:[%s1421_s2] ss:$0 sm:$0xff]  ;;  %s1113_s2 = smov 96   ;;  %s1117_s22 = smov 72   ;;  %vm167_vm8 = vcmask 64512   ;;  %vm240_vm9 = vcmask 1043456  }
   0x7   :  { %v1033_v52 = vld [vmem:[%s1423_s4] ss:$0 sm:$0xff]  ;;  %s1114_s4 = smov 120   ;;  %s1118_s23 = smov 104   ;;  %vm646_vm11 = vcmask 130048   ;;  %vm649_vm12 = vcmask 195584  }
   0x8   :  { %s1119_s24 = smov 64   ;;  %s1121_s25 = smov 48  }
   0x9   :  { %s1122_s26 = smov 56   ;;  %s1123_s27 = smov 40  }
   0xa   :  { %143 = vmatpush.bf16.msra.mxu0 %v984_v23  ;;  %s1124_s28 = smov 8   ;;  %s1125_s0 = smov 16  }
   0xb   :  { %55 = vadd.xlane.f32.xlu0 %v54_v3  ;;  %v1040_v5 = vpop.eup %1039  ;;  %s1126_s29 = smov 24  }
   0xc   :  { %v58_v6 = vmul.f32 32.0, %v1040_v5  ;;  %vm62_vm1 = vweird.f32 %v1040_v5 }
   0xe   :  { %v59_v7 = vsub.f32 1.0, %v58_v6 }
  0x10   :  { %v60_v8 = vmul.f32 %v1040_v5, %v59_v7 }
  0x12   :  { %v61_v9 = vadd.f32 %v1040_v5, %v60_v8 }
  0x14   :  { %v1213_v10 = vsel %vm62_vm1, %v1040_v5, %v61_v9 }
  0x76   :  { %v53_v11 = vpop.xlane.xlu0 %52 }
  0x77   :  { %v64_v12 = vmul.f32 %v1213_v10, %v53_v11 }
  0x79   :  { %v66_v13 = vsub.f32 %v1202_v0, %v64_v12 }
  0x7b   :  { %v68_v14 = vmul.f32 %v66_v13, %v66_v13 }
  0x7d   :  { %v70_v15 = vsel %vm50_vm0, %v68_v14, 0.0 }
  0x7e   :  { %71 = vadd.xlane.f32.xlu1 %v70_v15  ;;  %v56_v16 = vpop.xlane.xlu0 %55 }
  0x7f   :  { %v65_v17 = vmul.f32 %v1213_v10, %v56_v16 }
  0x81   :  { %v67_v18 = vsub.f32 %v1209_v2, %v65_v17 }
  0x83   :  { %v69_v19 = vmul.f32 %v67_v18, %v67_v18 }
  0x85   :  { %v73_v20 = vsel %vm50_vm0, %v69_v19, 0.0 }
  0x86   :  { %74 = vadd.xlane.f32.xlu1 %v73_v20 }
  0xf1   :  { %v72_v22 = vpop.xlane.xlu1 %71 }
  0xf2   :  { %v76_v24 = vmul.f32 %v72_v22, %v1213_v10 }
  0xf4   :  { %v78_v25 = vadd.f32 1e-05, %v76_v24 }
  0xf6   :  { %1041 = vrsqrt.f32 %v78_v25  ;;  %vm86_vm3 = vweird.f32 %v78_v25 }
  0xf9   :  { %v75_v26 = vpop.xlane.xlu1 %74 }
  0xfa   :  { %v77_v27 = vmul.f32 %v75_v26, %v1213_v10 }
  0xfc   :  { %v1042_v28 = vpop.eup %1041  ;;  %v79_v29 = vadd.f32 1e-05, %v77_v27 }
  0xfd   :  { %v81_v30 = vmul.f32 %v1042_v28, %v78_v25  ;;  %vm87_vm2 = vweird.f32 %v1042_v28 }
  0xfe   :  { %1043 = vrsqrt.f32 %v79_v29  ;;  %vm88_vm4 = vmor %vm86_vm3, %vm87_vm2  ;;  %vm96_vm6 = vweird.f32 %v79_v29 }
  0xff   :  { %v82_v31 = vmul.f32 %v1042_v28, %v81_v30 }
 0x101   :  { %v83_v32 = vmul.f32 0.5, %v82_v31 }
 0x103   :  { %v84_v33 = vsub.f32 1.5, %v83_v32 }
 0x104   :  { %v1044_v34 = vpop.eup %1043 }
 0x105   :  { %v85_v35 = vmul.f32 %v1042_v28, %v84_v33  ;;  %v91_v36 = vmul.f32 %v1044_v34, %v79_v29  ;;  %vm97_vm5 = vweird.f32 %v1044_v34 }
 0x106   :  { %vm98_vm7 = vmor %vm96_vm6, %vm97_vm5 }
 0x107   :  { %v92_v37 = vmul.f32 %v1044_v34, %v91_v36  ;;  %v89_v38 = vsel %vm88_vm4, %v1042_v28, %v85_v35 }
 0x108   :  { %v100_v41 = vmul.f32 %v89_v38, %v66_v13 }
 0x109   :  { %v93_v39 = vmul.f32 0.5, %v92_v37  ;;  %v1120_v37 = vmov -1e+09  }
 0x10a   :  { %v105_v46 = vmul.f32 %v1031_v42, %v100_v41 }
 0x10b   :  { %v94_v40 = vsub.f32 1.5, %v93_v39 }
 0x10c   :  { %v110_v49 = vadd.f32 %v1032_v47, %v105_v46 }
 0x10d   :  { %v95_v43 = vmul.f32 %v1044_v34, %v94_v40 }
 0x10f   :  { %v99_v44 = vsel %vm98_vm7, %v1044_v34, %v95_v43  ;;  %v156_v34 = vlaneseq }
 0x110   :  { %v101_v45 = vmul.f32 %v99_v44, %v67_v18 }
 0x111   :  { %v157_v35 = vshrl.u32 %v156_v34, 7  ;;  %v159_v36 = vand.u32 127, %v156_v34 }
 0x112   :  { %v106_v48 = vmul.f32 %v1031_v42, %v101_v45 }
 0x113   :  { %vm160_vm10 = vcmp.ge.s32.totalorder %v157_v35, %v159_v36 }
 0x114   :  { %v111_v50 = vadd.f32 %v1032_v47, %v106_v48  ;;  %v161_v38 = vsel %vm160_vm10, 0.0, %v1120_v37 }
 0x116   :  { %v112_v51 = vpack.c.bf16 %v111_v50, %v110_v49 }
 0x118   :  { %917 = vmatmul.msk.bf16.vlgmr.msra.gmra.mxu0 %vm50_vm0, %v112_v51 }
 0x195   :  { %v145_v53 = vpop.f32.mrf.mxu0 }
 0x196   :  { %v146_v54 = vadd.f32 %v1033_v52, %v145_v53 }
 0x198   :  { %v150_v55 = vmul.f32 0.35355338, %v146_v54  ;;  %v154_v56 = vpack.c.bf16 %v146_v54, %v146_v54 }
 0x19a   :  { %v152_v57 = vpack.c.bf16 %v150_v55, %v150_v55  ;;  %v163_v58 = vunpack.c.l.b16 %v154_v56 }
 0x19c   :  { %v1239_v59 = vpack.c.b16 %v163_v58, %v163_v58  ;;  %v279_v60 = vunpack.c.l.b16 %v152_v57 }
 0x19d   :  { %v147_v61 = vpop.f32.mrf.mxu0 }
 0x19e   :  { %v148_v62 = vadd.f32 %v1033_v52, %v147_v61  ;;  %283 = vrot.lane.b32.xlu0 %v1239_v59, %s1112_s1  ;;  %165 = vrot.lane.b32.xlu2 %v1239_v59, %s1113_s2  ;;  %v280_v63 = vpack.c.b16 %v279_v60, %v279_v60 }
 0x1a0   :  { %v151_v1 = vmul.f32 0.35355338, %v148_v62  ;;  %v155_v3 = vpack.c.bf16 %v148_v62, %v148_v62  ;;  %281 = vrot.lane.b32.xlu1 %v280_v63, %s1114_s4 }
 0x1a2   :  { %v153_v4 = vpack.c.bf16 %v151_v1, %v151_v1  ;;  %v188_v5 = vunpack.c.l.b16 %v155_v3 }
 0x1a4   :  { %v1243_v6 = vpack.c.b16 %v188_v5, %v188_v5  ;;  %v305_v7 = vunpack.c.l.b16 %v153_v4 }
 0x1a6   :  { %421 = vrot.lane.b32.xlu0 %v1243_v6, %s1115_s20  ;;  %190 = vrot.lane.b32.xlu2 %v1243_v6, %s1113_s2  ;;  %v306_v8 = vpack.c.b16 %v305_v7, %v305_v7 }
 0x1a8   :  { %419 = vrot.lane.b32.xlu1 %v306_v8, %s1116_s21 }
 0x1ae   :  { %510 = vrot.lane.b32.xlu0 %v1239_v59, %s1117_s22  ;;  %309 = vrot.lane.b32.xlu2 %v1243_v6, %s1112_s1 }
 0x1b0   :  { %508 = vrot.lane.b32.xlu1 %v280_v63, %s1118_s23 }
 0x1b6   :  { %531 = vrot.lane.b32.xlu0 %v306_v8, %s1118_s23  ;;  %307 = vrot.lane.b32.xlu2 %v306_v8, %s1114_s4 }
 0x1be   :  { %235 = vrot.lane.b32.xlu0 %v1239_v59, %s1119_s24  ;;  %398 = vrot.lane.b32.xlu2 %v1239_v59, %s1115_s20 }
 0x1c6   :  { %396 = vrot.lane.b32.xlu2 %v280_v63, %s1116_s21 }
 0x1ce   :  { %533 = vrot.lane.b32.xlu2 %v1243_v6, %s1117_s22 }
 0x1f8   :  { %v166_v9 = vpop.permute.xlu2 %165 }
 0x1f9   :  { %v172_v11 = vsel %vm167_vm8, %v166_v9, 0 }
 0x1fa   :  { %181 = vmatpush.bf16.xpose.msra.mxu1 %v172_v11 }
 0x200   :  { %v191_v12 = vpop.permute.xlu2 %190 }
 0x201   :  { %918 = vmatmul.msk.bf16.vlgmr.msra.gmra.mxu1 %vm167_vm8, %v152_v57  ;;  %v196_v13 = vsel %vm167_vm8, %v191_v12, 0 }
 0x202   :  { %205 = vmatpush.bf16.xpose.msra.mxu2 %v196_v13 }
 0x208   :  { %v310_v14 = vpop.permute.xlu2 %309 }
 0x209   :  { %919 = vmatmul.msk.bf16.vlgmr.msra.gmra.mxu2 %vm167_vm8, %v153_v4  ;;  %v315_v15 = vsel %vm167_vm8, %v310_v14, 0 }
 0x20a   :  { %324 = vmatpush.bf16.xpose.msrb.mxu1 %v315_v15 }
 0x210   :  { %v284_v16 = vpop.permute.xlu0 %283  ;;  %v308_v17 = vpop.permute.xlu2 %307 }
 0x211   :  { %923 = vmatmul.msk.bf16.vlgmr.msrb.gmra.mxu1 %vm167_vm8, %v308_v17  ;;  %v289_v18 = vsel %vm167_vm8, %v284_v16, 0 }
 0x212   :  { %298 = vmatpush.bf16.xpose.msrb.mxu0 %v289_v18  ;;  %v282_v19 = vpop.permute.xlu1 %281 }
 0x218   :  { %v422_v20 = vpop.permute.xlu0 %421  ;;  %v399_v21 = vpop.permute.xlu2 %398 }
 0x219   :  { %v427_v22 = vsel %vm167_vm8, %v422_v20, 0  ;;  %v404_v23 = vsel %vm167_vm8, %v399_v21, 0  ;;  %922 = vmatmul.msk.bf16.vlgmr.msrb.gmra.mxu0 %vm167_vm8, %v282_v19 }
 0x21a   :  { %413 = vmatpush.bf16.xpose.msra.mxu0 %v404_v23  ;;  %436 = vmatpush.bf16.xpose.msra.mxu1 %v427_v22  ;;  %v420_v24 = vpop.permute.xlu1 %419 }
 0x220   :  { %v511_v25 = vpop.permute.xlu0 %510  ;;  %v397_v26 = vpop.permute.xlu2 %396 }
 0x221   :  { %v516_v27 = vsel %vm167_vm8, %v511_v25, 0  ;;  %927 = vmatmul.msk.bf16.vlgmr.msra.gmra.mxu1 %vm167_vm8, %v420_v24 }
 0x222   :  { %525 = vmatpush.bf16.xpose.msrb.mxu0 %v516_v27  ;;  %v509_v33 = vpop.permute.xlu1 %508 }
 0x228   :  { %v532_v28 = vpop.permute.xlu0 %531  ;;  %v534_v29 = vpop.permute.xlu2 %533 }
 0x229   :  { %v539_v30 = vsel %vm167_vm8, %v534_v29, 0  ;;  %926 = vmatmul.msk.bf16.vlgmr.msra.gmra.mxu0 %vm167_vm8, %v397_v26 }
 0x22a   :  { %548 = vmatpush.bf16.xpose.msrb.mxu1 %v539_v30 }
 0x230   :  { %v236_v31 = vpop.permute.xlu0 %235 }
 0x231   :  { %931 = vmatmul.msk.bf16.vlgmr.msrb.gmra.mxu1 %vm167_vm8, %v532_v28  ;;  %v242_v32 = vsel %vm240_vm9, %v236_v31, 0 }
 0x232   :  { %251 = vmatpush.bf16.msra.mxu3 %v242_v32 }
 0x239   :  { %930 = vmatmul.msk.bf16.vlgmr.msrb.gmra.mxu0 %vm167_vm8, %v509_v33 }
 0x27e   :  { %v183_v39 = vpop.f32.mrf.mxu1 }
 0x27f   :  { %v184_v40 = vadd.f32 %v183_v39, %v161_v38 }
 0x281   :  { %v211_v41 = vsel %vm167_vm8, %v184_v40, -inf }
 0x282   :  { %212 = vmax.xlane.f32.xlu2 %v211_v41 }
 0x286   :  { %v185_v42 = vpop.f32.mrf.mxu1 }
 0x28c   :  { %v207_v43 = vpop.f32.mrf.mxu2 }
 0x28d   :  { %v208_v44 = vadd.f32 %v207_v43, %v161_v38 }
 0x28e   :  { %v326_v45 = vpop.f32.mrf.mxu1 }
 0x28f   :  { %v1271_v46 = vadd.f32 %v326_v45, %v161_v38  ;;  %v214_v47 = vsel %vm167_vm8, %v208_v44, -inf }
 0x290   :  { %215 = vmax.xlane.f32.xlu1 %v214_v47 }
 0x291   :  { %v333_v48 = vsel %vm167_vm8, %v1271_v46, -inf }
 0x292   :  { %334 = vmax.xlane.f32.xlu2 %v333_v48 }
 0x294   :  { %v209_v49 = vpop.f32.mrf.mxu2 }
 0x296   :  { %v300_v50 = vpop.f32.mrf.mxu0  ;;  %v328_v51 = vpop.f32.mrf.mxu1 }
 0x297   :  { %v301_v52 = vadd.f32 %v300_v50, %v161_v38 }
 0x299   :  { %v330_v53 = vsel %vm167_vm8, %v301_v52, -inf }
 0x29a   :  { %331 = vmax.xlane.f32.xlu0 %v330_v53 }
 0x29e   :  { %v302_v54 = vpop.f32.mrf.mxu0  ;;  %v438_v55 = vpop.f32.mrf.mxu1 }
 0x29f   :  { %v1277_v56 = vadd.f32 %v438_v55, %v161_v38 }
 0x2a1   :  { %v445_v57 = vsel %vm167_vm8, %v1277_v56, -inf }
 0x2a2   :  { %446 = vmax.xlane.f32.xlu1 %v445_v57 }
 0x2a6   :  { %v415_v58 = vpop.f32.mrf.mxu0  ;;  %v440_v60 = vpop.f32.mrf.mxu1 }
 0x2a7   :  { %v416_v61 = vadd.f32 %v415_v58, %v161_v38 }
 0x2a9   :  { %v442_v62 = vsel %vm167_vm8, %v416_v61, -inf }
 0x2aa   :  { %443 = vmax.xlane.f32.xlu2 %v442_v62 }
 0x2ae   :  { %v417_v63 = vpop.f32.mrf.mxu0  ;;  %v550_v1 = vpop.f32.mrf.mxu1 }
 0x2af   :  { %v1282_v3 = vadd.f32 %v550_v1, %v161_v38 }
 0x2b1   :  { %v557_v4 = vsel %vm167_vm8, %v1282_v3, -inf }
 0x2b2   :  { %558 = vmax.xlane.f32.xlu0 %v557_v4 }
 0x2b6   :  { %v527_v5 = vpop.f32.mrf.mxu0  ;;  %v552_v7 = vpop.f32.mrf.mxu1 }
 0x2b7   :  { %v528_v8 = vadd.f32 %v527_v5, %v161_v38 }
 0x2b9   :  { %v554_v9 = vsel %vm167_vm8, %v528_v8, -inf }
 0x2ba   :  { %555 = vmax.xlane.f32.xlu2 %v554_v9 }
 0x2be   :  { %v529_v11 = vpop.f32.mrf.mxu0 }
 0x2c6   :  { %466 = vrot.lane.b32.xlu0 %v1239_v59, %s1121_s25 }
 0x2d2   :  { %354 = vrot.lane.b32.xlu2 %v1239_v59, %s1122_s26 }
 0x2f5   :  { %v213_v12 = vpop.xlane.xlu2 %212 }
 0x2f6   :  { %v217_v13 = vsub.f32 %v184_v40, %v213_v12 }
 0x2f8   :  { %v219_v14 = vmul.f32 1.442695, %v217_v13 }
 0x2fa   :  { %1045 = vpow2.f32 %v219_v14 }
 0x300   :  { %v1046_v15 = vpop.eup %1045 }
 0x301   :  { %v223_v16 = vsel %vm167_vm8, %v1046_v15, 0.0 }
 0x302   :  { %224 = vadd.xlane.f32.xlu1 %v223_v16 }
 0x303   :  { %v216_v17 = vpop.xlane.xlu1 %215 }
 0x304   :  { %v218_v20 = vsub.f32 %v208_v44, %v216_v17 }
 0x305   :  { %v335_v23 = vpop.xlane.xlu2 %334 }
 0x306   :  { %v221_v22 = vmul.f32 1.442695, %v218_v20  ;;  %v337_v37 = vsub.f32 %v1271_v46, %v335_v23 }
 0x308   :  { %v340_v38 = vmul.f32 1.442695, %v337_v37 }
 0x30d   :  { %v332_v18 = vpop.xlane.xlu0 %331 }
 0x30e   :  { %v336_v19 = vsub.f32 %v301_v52, %v332_v18 }
 0x310   :  { %v338_v21 = vmul.f32 1.442695, %v336_v19 }
 0x312   :  { %1047 = vpow2.f32 %v338_v21 }
 0x313   :  { %1049 = vpow2.f32 %v221_v22 }
 0x315   :  { %v447_v45 = vpop.xlane.xlu1 %446 }
 0x316   :  { %v449_v46 = vsub.f32 %v1277_v56, %v447_v45 }
 0x318   :  { %v1292_v24 = vpop.eup %1047  ;;  %v452_v47 = vmul.f32 1.442695, %v449_v46 }
 0x319   :  { %v342_v25 = vsel %vm167_vm8, %v1292_v24, 0.0  ;;  %v1050_v27 = vpop.eup %1049 }
 0x31a   :  { %343 = vadd.xlane.f32.xlu2 %v342_v25  ;;  %v226_v30 = vsel %vm167_vm8, %v1050_v27, 0.0 }
 0x31b   :  { %257 = vrot.lane.b32.xlu1 %v1243_v6, %s1119_s24 }
 0x31d   :  { %v444_v26 = vpop.xlane.xlu2 %443 }
 0x31e   :  { %v448_v28 = vsub.f32 %v416_v61, %v444_v26 }
 0x320   :  { %v450_v29 = vmul.f32 1.442695, %v448_v28 }
 0x322   :  { %1051 = vpow2.f32 %v450_v29  ;;  %227 = vadd.xlane.f32.xlu2 %v226_v30 }
 0x325   :  { %v559_v35 = vpop.xlane.xlu0 %558 }
 0x326   :  { %v561_v51 = vsub.f32 %v1282_v3, %v559_v35 }
 0x328   :  { %v1299_v31 = vpop.eup %1051  ;;  %v564_v52 = vmul.f32 1.442695, %v561_v51 }
 0x329   :  { %v454_v32 = vsel %vm167_vm8, %v1299_v31, 0.0 }
 0x32a   :  { %455 = vadd.xlane.f32.xlu0 %v454_v32 }
 0x32d   :  { %v556_v33 = vpop.xlane.xlu2 %555 }
 0x32e   :  { %v560_v34 = vsub.f32 %v528_v8, %v556_v33 }
 0x330   :  { %v562_v36 = vmul.f32 1.442695, %v560_v34 }
 0x332   :  { %1053 = vpow2.f32 %v562_v36 }
 0x333   :  { %1055 = vpow2.f32 %v340_v38 }
 0x334   :  { %1057 = vpow2.f32 %v452_v47 }
 0x335   :  { %v355_v57 = vpop.permute.xlu2 %354 }
 0x336   :  { %v360_v62 = vsel %vm240_vm9, %v355_v57, 0  ;;  %v986_v57 = vld [vmem:[%s1424_s5] sm:$0xff] }
 0x338   :  { %v1304_v39 = vpop.eup %1053  ;;  %v467_v40 = vpop.permute.xlu0 %466 }
 0x339   :  { %v472_v41 = vsel %vm240_vm9, %v467_v40, 0  ;;  %v566_v42 = vsel %vm167_vm8, %v1304_v39, 0.0  ;;  %v1056_v43 = vpop.eup %1055 }
 0x33a   :  { %481 = vmatpush.bf16.msrb.mxu2 %v472_v41  ;;  %375 = vrot.lane.b32.xlu2 %v1243_v6, %s1122_s26  ;;  %v345_v44 = vsel %vm167_vm8, %v1056_v43, 0.0  ;;  %v1058_v48 = vpop.eup %1057 }
 0x33b   :  { %567 = vadd.xlane.f32.xlu0 %v566_v42  ;;  %v457_v49 = vsel %vm167_vm8, %v1058_v48, 0.0 }
 0x345   :  { %346 = vadd.xlane.f32.xlu1 %v345_v44 }
 0x34f   :  { %599 = vrot.lane.b32.xlu0 %v1243_v6, %s1123_s27 }
 0x35e   :  { %487 = vrot.lane.b32.xlu1 %v1243_v6, %s1121_s25 }
 0x363   :  { %458 = vadd.xlane.f32.xlu2 %v457_v49 }
 0x375   :  { %v225_v50 = vpop.xlane.xlu1 %224 }
 0x376   :  { %1059 = vrcp.f32 %v225_v50 }
 0x377   :  { %1061 = vpow2.f32 %v564_v52 }
 0x37b   :  { %578 = vrot.lane.b32.xlu2 %v1239_v59, %s1123_s27 }
 0x37c   :  { %v1060_v53 = vpop.eup %1059 }
 0x37d   :  { %v231_v54 = vmul.f32 %v1060_v53, %v1046_v15  ;;  %v1062_v56 = vpop.eup %1061 }
 0x37e   :  { %v569_v6 = vsel %vm167_vm8, %v1062_v56, 0.0 }
 0x37f   :  { %v233_v55 = vpack.c.bf16 %v231_v54, %v231_v54 }
 0x381   :  { %920 = vmatmul.msk.bf16.vlgmr.msra.gmra.mxu3 %vm167_vm8, %v233_v55 }
 0x388   :  { %570 = vadd.xlane.f32.xlu1 %v569_v6 }
 0x38d   :  { %v258_v58 = vpop.permute.xlu1 %257  ;;  %v344_v60 = vpop.xlane.xlu2 %343 }
 0x38e   :  { %v263_v61 = vsel %vm240_vm9, %v258_v58, 0 }
 0x38f   :  { %272 = vmatpush.bf16.msrb.mxu3 %v263_v61 }
 0x393   :  { %369 = vmatpush.bf16.msra.mxu3 %v360_v62 }
 0x395   :  { %v228_v59 = vpop.xlane.xlu2 %227 }
 0x396   :  { %1063 = vrcp.f32 %v228_v59 }
 0x39c   :  { %v1064_v63 = vpop.eup %1063 }
 0x39d   :  { %v232_v1 = vmul.f32 %v1064_v63, %v1050_v27  ;;  %v456_v3 = vpop.xlane.xlu0 %455  ;;  %v376_v4 = vpop.permute.xlu2 %375 }
 0x39e   :  { %1065 = vrcp.f32 %v456_v3  ;;  %v381_v7 = vsel %vm240_vm9, %v376_v4, 0 }
 0x39f   :  { %v234_v5 = vpack.c.bf16 %v232_v1, %v232_v1  ;;  %1067 = vrcp.f32 %v344_v60 }
 0x3a1   :  { %921 = vmatmul.msk.bf16.vlgmr.msrb.gmra.mxu3 %vm167_vm8, %v234_v5 }
 0x3a2   :  { %390 = vmatpush.bf16.msrb.mxu3 %v381_v7 }
 0x3a4   :  { %v1066_v8 = vpop.eup %1065 }
 0x3a5   :  { %v462_v9 = vmul.f32 %v1066_v8, %v1299_v31  ;;  %v1068_v12 = vpop.eup %1067 }
 0x3a6   :  { %v350_v13 = vmul.f32 %v1068_v12, %v1292_v24 }
 0x3a7   :  { %v464_v11 = vpack.c.bf16 %v462_v9, %v462_v9 }
 0x3a8   :  { %v352_v14 = vpack.c.bf16 %v350_v13, %v350_v13  ;;  %v1034_v13 = vld [vmem:[%s1425_s6] ss:$0 sm:$0xff]  ;;  %s1127_s6 = smov [#allocation2]  }
 0x3a9   :  { %928 = vmatmul.msk.bf16.vlgmr.msrb.gmra.mxu2 %vm167_vm8, %v464_v11  ;;  %s895_s17 = sshll.u32 %s1127_s6, 4  ;;  %s896_s17 = int_to_ptr.vmem [resolvable:$true] %s895_s17 }
 0x3ae   :  { %v568_v19 = vpop.xlane.xlu0 %567 }
 0x3b1   :  { %924 = vmatmul.msk.bf16.vlgmr.msra.gmra.mxu3 %vm167_vm8, %v352_v14 }
 0x3b8   :  { %v347_v15 = vpop.xlane.xlu1 %346 }
 0x3b9   :  { %1069 = vrcp.f32 %v347_v15 }
 0x3ba   :  { %1071 = vrcp.f32 %v568_v19 }
 0x3bf   :  { %v1070_v16 = vpop.eup %1069 }
 0x3c0   :  { %v351_v17 = vmul.f32 %v1070_v16, %v1056_v43  ;;  %v1072_v25 = vpop.eup %1071 }
 0x3c1   :  { %v600_v20 = vpop.permute.xlu0 %599  ;;  %v574_v27 = vmul.f32 %v1072_v25, %v1304_v39 }
 0x3c2   :  { %v353_v18 = vpack.c.bf16 %v351_v17, %v351_v17  ;;  %v605_v23 = vsel %vm240_vm9, %v600_v20, 0 }
 0x3c3   :  { %v576_v32 = vpack.c.bf16 %v574_v27, %v574_v27 }
 0x3c4   :  { %925 = vmatmul.msk.bf16.vlgmr.msrb.gmra.mxu3 %vm167_vm8, %v353_v18 }
 0x3d0   :  { %v488_v21 = vpop.permute.xlu1 %487 }
 0x3d1   :  { %v493_v22 = vsel %vm240_vm9, %v488_v21, 0 }
 0x3d2   :  { %502 = vmatpush.bf16.msra.mxu3 %v493_v22 }
 0x3d6   :  { %614 = vmatpush.bf16.msrb.mxu3 %v605_v23  ;;  %v459_v24 = vpop.xlane.xlu2 %458 }
 0x3d7   :  { %1073 = vrcp.f32 %v459_v24 }
 0x3dd   :  { %v1074_v26 = vpop.eup %1073 }
 0x3de   :  { %v463_v28 = vmul.f32 %v1074_v26, %v1058_v48  ;;  %v579_v29 = vpop.permute.xlu2 %578 }
 0x3df   :  { %v584_v30 = vsel %vm240_vm9, %v579_v29, 0 }
 0x3e0   :  { %v465_v31 = vpack.c.bf16 %v463_v28, %v463_v28  ;;  %593 = vmatpush.bf16.msra.mxu2 %v584_v30  ;;  %v989_v30 = vld [vmem:[%s1428_s9 + $0x8] sm:$0xff] }
 0x3e1   :  { %778 = vmatpush.bf16.msra.mxu1 %v989_v30 }
 0x3e2   :  { %929 = vmatmul.msk.bf16.vlgmr.msra.gmra.mxu3 %vm167_vm8, %v465_v31 }
 0x3e3   :  { %932 = vmatmul.msk.bf16.vlgmr.msra.gmra.mxu2 %vm167_vm8, %v576_v32 }
 0x3fb   :  { %v571_v33 = vpop.xlane.xlu1 %570 }
 0x3fc   :  { %1075 = vrcp.f32 %v571_v33 }
 0x402   :  { %v1076_v34 = vpop.eup %1075 }
 0x403   :  { %v575_v35 = vmul.f32 %v1076_v34, %v1062_v56  ;;  %v987_v56 = vld [vmem:[%s1424_s5 + $0x8] sm:$0xff]  ;;  %v988_v34 = vld [vmem:[%s1428_s9] sm:$0xff]  ;;  %s897_s9 = sshll.u32 %s1432_s13, 4  ;;  %s898_s9 = int_to_ptr.hbm [resolvable:$true] %s897_s9 }
 0x404   :  { %v253_v36 = vpop.f32.mrf.mxu3  ;;  %682 = vmatpush.bf16.msra.mxu0 %v987_v56  ;;  %779 = vmatpush.bf16.msra.mxu1 %v988_v34 }
 0x405   :  { %v577_v37 = vpack.c.bf16 %v575_v35, %v575_v35 }
 0x407   :  { %933 = vmatmul.msk.bf16.vlgmr.msrb.gmra.mxu3 %vm167_vm8, %v577_v37 }
 0x408   :  { %683 = vmatpush.bf16.msra.mxu0 %v986_v57 }
 0x40c   :  { %v255_v38 = vpop.f32.mrf.mxu3 }
 0x424   :  { %v274_v39 = vpop.f32.mrf.mxu3 }
 0x42c   :  { %v276_v40 = vpop.f32.mrf.mxu3  ;;  %v483_v41 = vpop.f32.mrf.mxu2 }
 0x434   :  { %v371_v42 = vpop.f32.mrf.mxu3  ;;  %v485_v43 = vpop.f32.mrf.mxu2 }
 0x43c   :  { %v373_v44 = vpop.f32.mrf.mxu3 }
 0x447   :  { %v392_v45 = vpop.f32.mrf.mxu3 }
 0x448   :  { %v1016_v46 = vpack.i.bf16 %v392_v45, %v371_v42 }
 0x44a   :  { %1017 = vrot.lane.b32.xlu2 %v1016_v46, %s1124_s28 }
 0x44f   :  { %v394_v47 = vpop.f32.mrf.mxu3 }
 0x465   :  { %v504_v48 = vpop.f32.mrf.mxu3 }
 0x466   :  { %v1021_v49 = vpack.i.bf16 %v504_v48, %v483_v41  ;;  %v595_v50 = vpop.f32.mrf.mxu2 }
 0x468   :  { %1022 = vrot.lane.b32.xlu2 %v1021_v49, %s1125_s0 }
 0x46d   :  { %v506_v51 = vpop.f32.mrf.mxu3 }
 0x46e   :  { %v597_v52 = vpop.f32.mrf.mxu2 }
 0x48a   :  { %v616_v53 = vpop.f32.mrf.mxu3 }
 0x48b   :  { %v1026_v54 = vpack.i.bf16 %v616_v53, %v595_v50  ;;  %v1036_v53 = vld [vmem:[%s1427_s8] ss:$0 sm:$0xff] }
 0x48d   :  { %1027 = vrot.lane.b32.xlu1 %v1026_v54, %s1126_s29 }
 0x492   :  { %v618_v55 = vpop.f32.mrf.mxu3 }
 0x4a4   :  { %v1018_v6 = vpop.permute.xlu2 %1017 }
 0x4a5   :  { %v1020_v60 = vunpack.i.h.bf16 %v1018_v6  ;;  %v1019_v61 = vunpack.i.l.bf16 %v1018_v6 }
 0x4a7   :  { %v645_v1 = vsel %vm167_vm8, %v274_v39, %v1020_v60  ;;  %v644_v3 = vsel %vm167_vm8, %v253_v36, %v1019_v61  ;;  %v997_v60 = vld [vmem:[%s1430_s11 + $0x38] sm:$0xff]  ;;  %v996_v61 = vld [vmem:[%s1430_s11 + $0x30] sm:$0xff] }
 0x4a8   :  { %873 = vmatpush.bf16.msrb.mxu2 %v997_v60 }
 0x4ac   :  { %874 = vmatpush.bf16.msrb.mxu2 %v996_v61 }
 0x4c2   :  { %v1023_v58 = vpop.permute.xlu2 %1022 }
 0x4c3   :  { %v1025_v62 = vunpack.i.h.bf16 %v1023_v58  ;;  %v1024_v59 = vunpack.i.l.bf16 %v1023_v58 }
 0x4c5   :  { %v647_v7 = vsel %vm646_vm11, %v644_v3, %v1024_v59  ;;  %v648_v8 = vsel %vm646_vm11, %v645_v1, %v1025_v62  ;;  %v995_v62 = vld [vmem:[%s1430_s11 + $0x28] sm:$0xff]  ;;  %v994_v59 = vld [vmem:[%s1430_s11 + $0x20] sm:$0xff]  ;;  %v992_v1 = vld [vmem:[%s1430_s11 + $0x10] sm:$0xff] }
 0x4c6   :  { %875 = vmatpush.bf16.msrb.mxu2 %v995_v62  ;;  %v991_v3 = vld [vmem:[%s1430_s11 + $0x8] sm:$0xff] }
 0x4ca   :  { %876 = vmatpush.bf16.msrb.mxu2 %v994_v59 }
 0x4ff   :  { %v1028_v63 = vpop.permute.xlu1 %1027 }
 0x500   :  { %v1030_v4 = vunpack.i.h.bf16 %v1028_v63  ;;  %v1029_v5 = vunpack.i.l.bf16 %v1028_v63  ;;  %v993_v63 = vld [vmem:[%s1430_s11 + $0x18] sm:$0xff] }
 0x501   :  { %877 = vmatpush.bf16.msrb.mxu2 %v993_v63 }
 0x502   :  { %v650_v9 = vsel %vm649_vm12, %v647_v7, %v1029_v5  ;;  %v651_v11 = vsel %vm649_vm12, %v648_v8, %v1030_v4  ;;  %v990_v4 = vld [vmem:[%s1430_s11] sm:$0xff] }
 0x503   :  { %v652_v12 = vpack.c.bf16 %v651_v11, %v650_v9  ;;  %v1037_v5 = vld [vmem:[%s1429_s10] ss:$0 sm:$0xff] }
 0x505   :  { %942 = vmatmul.msk.bf16.vlgmr.msra.gmra.mxu0 %vm50_vm0, %v652_v12  ;;  %878 = vmatpush.bf16.msrb.mxu2 %v992_v1 }
 0x509   :  { %879 = vmatpush.bf16.msrb.mxu2 %v991_v3 }
 0x50d   :  { %880 = vmatpush.bf16.msrb.mxu2 %v990_v4 }
 0x582   :  { %v685_v14 = vpop.f32.mrf.mxu0 }
 0x583   :  { %v686_v15 = vadd.f32 %v1034_v13, %v685_v14 }
 0x585   :  { %v1351_v16 = vadd.f32 %v686_v15, %v1202_v0 }
 0x587   :  { %v694_v17 = vsel %vm50_vm0, %v1351_v16, 0.0 }
 0x588   :  { %695 = vadd.xlane.f32.xlu2 %v694_v17 }
 0x58a   :  { %v687_v18 = vpop.f32.mrf.mxu0 }
 0x58b   :  { %v688_v19 = vadd.f32 %v1034_v13, %v687_v18 }
 0x58d   :  { %v1356_v20 = vadd.f32 %v688_v19, %v1209_v2 }
 0x58f   :  { %v697_v21 = vsel %vm50_vm0, %v1356_v20, 0.0 }
 0x590   :  { %698 = vadd.xlane.f32.xlu0 %v697_v21 }
 0x5fb   :  { %v696_v22 = vpop.xlane.xlu2 %695 }
 0x5fc   :  { %v700_v23 = vmul.f32 %v696_v22, %v1213_v10 }
 0x5fe   :  { %v702_v24 = vsub.f32 %v1351_v16, %v700_v23 }
 0x600   :  { %v704_v0 = vmul.f32 %v702_v24, %v702_v24 }
 0x602   :  { %v706_v25 = vsel %vm50_vm0, %v704_v0, 0.0 }
 0x603   :  { %v699_v26 = vpop.xlane.xlu0 %698  ;;  %707 = vadd.xlane.f32.xlu1 %v706_v25 }
 0x604   :  { %v701_v27 = vmul.f32 %v699_v26, %v1213_v10 }
 0x606   :  { %v703_v28 = vsub.f32 %v1356_v20, %v701_v27 }
 0x608   :  { %v705_v2 = vmul.f32 %v703_v28, %v703_v28 }
 0x60a   :  { %v709_v29 = vsel %vm50_vm0, %v705_v2, 0.0 }
 0x60b   :  { %710 = vadd.xlane.f32.xlu2 %v709_v29 }
 0x676   :  { %v708_v31 = vpop.xlane.xlu1 %707 }
 0x677   :  { %v712_v32 = vmul.f32 %v708_v31, %v1213_v10  ;;  %v1038_v31 = vld [vmem:[%s1431_s12] ss:$0 sm:$0xff]  ;;  %s1128_s12 = smov 128  }
 0x679   :  { %v714_v33 = vadd.f32 1e-05, %v712_v32 }
 0x67b   :  { %1077 = vrsqrt.f32 %v714_v33  ;;  %vm722_vm14 = vweird.f32 %v714_v33 }
 0x67e   :  { %v711_v35 = vpop.xlane.xlu2 %710 }
 0x67f   :  { %v713_v36 = vmul.f32 %v711_v35, %v1213_v10  ;;  %v1035_v10 = vld [vmem:[%s1426_s7] ss:$0 sm:$0xff] }
 0x681   :  { %v1078_v37 = vpop.eup %1077  ;;  %v715_v38 = vadd.f32 1e-05, %v713_v36 }
 0x682   :  { %v717_v39 = vmul.f32 %v1078_v37, %v714_v33  ;;  %vm723_vm13 = vweird.f32 %v1078_v37 }
 0x683   :  { %1079 = vrsqrt.f32 %v715_v38  ;;  %vm724_vm15 = vmor %vm722_vm14, %vm723_vm13  ;;  %vm732_vm2 = vweird.f32 %v715_v38 }
 0x684   :  { %v718_v40 = vmul.f32 %v1078_v37, %v717_v39 }
 0x686   :  { %v719_v41 = vmul.f32 0.5, %v718_v40 }
 0x688   :  { %v720_v42 = vsub.f32 1.5, %v719_v41 }
 0x689   :  { %v1080_v43 = vpop.eup %1079 }
 0x68a   :  { %v721_v44 = vmul.f32 %v1078_v37, %v720_v42  ;;  %v727_v45 = vmul.f32 %v1080_v43, %v715_v38  ;;  %vm733_vm1 = vweird.f32 %v1080_v43 }
 0x68b   :  { %vm734_vm3 = vmor %vm732_vm2, %vm733_vm1 }
 0x68c   :  { %v728_v46 = vmul.f32 %v1080_v43, %v727_v45  ;;  %v725_v47 = vsel %vm724_vm15, %v1078_v37, %v721_v44 }
 0x68d   :  { %v736_v50 = vmul.f32 %v725_v47, %v702_v24 }
 0x68e   :  { %v729_v48 = vmul.f32 0.5, %v728_v46 }
 0x68f   :  { %v741_v54 = vmul.f32 %v1035_v10, %v736_v50 }
 0x690   :  { %v730_v49 = vsub.f32 1.5, %v729_v48 }
 0x691   :  { %v746_v57 = vadd.f32 %v1036_v53, %v741_v54 }
 0x692   :  { %v731_v51 = vmul.f32 %v1080_v43, %v730_v49 }
 0x694   :  { %v735_v52 = vsel %vm734_vm3, %v1080_v43, %v731_v51 }
 0x695   :  { %v737_v55 = vmul.f32 %v735_v52, %v703_v28 }
 0x697   :  { %v742_v56 = vmul.f32 %v1035_v10, %v737_v55 }
 0x699   :  { %v747_v6 = vadd.f32 %v1036_v53, %v742_v56 }
 0x69b   :  { %v748_v58 = vpack.c.bf16 %v747_v6, %v746_v57 }
 0x69d   :  { %951 = vmatmul.msk.bf16.vlgmr.msra.gmra.mxu1 %vm50_vm0, %v748_v58 }
 0x71a   :  { %v781_v7 = vpop.f32.mrf.mxu1 }
 0x71b   :  { %v782_v8 = vadd.f32 %v1037_v5, %v781_v7 }
 0x71d   :  { %v788_v9 = vmul.f32 0.044715, %v782_v8  ;;  %v786_v26 = vmul.f32 0.5, %v782_v8 }
 0x71f   :  { %v790_v11 = vmul.f32 %v788_v9, %v782_v8 }
 0x721   :  { %v792_v12 = vmul.f32 %v790_v11, %v782_v8 }
 0x722   :  { %v783_v13 = vpop.f32.mrf.mxu1 }
 0x723   :  { %v794_v14 = vadd.f32 %v792_v12, %v782_v8  ;;  %v784_v15 = vadd.f32 %v1037_v5, %v783_v13 }
 0x725   :  { %v789_v17 = vmul.f32 0.044715, %v784_v15  ;;  %v796_v18 = vmul.f32 0.7978846, %v794_v14  ;;  %v787_v27 = vmul.f32 0.5, %v784_v15 }
 0x727   :  { %v791_v19 = vmul.f32 %v789_v17, %v784_v15  ;;  %1081 = vtanh.f32 %v796_v18 }
 0x729   :  { %v793_v21 = vmul.f32 %v791_v19, %v784_v15 }
 0x72b   :  { %v795_v22 = vadd.f32 %v793_v21, %v784_v15 }
 0x72d   :  { %v797_v23 = vmul.f32 0.7978846, %v795_v22  ;;  %v1082_v24 = vpop.eup %1081 }
 0x72e   :  { %v800_v0 = vadd.f32 1.0, %v1082_v24 }
 0x72f   :  { %1083 = vtanh.f32 %v797_v23 }
 0x730   :  { %v802_v2 = vmul.f32 %v800_v0, %v786_v26 }
 0x735   :  { %v1084_v25 = vpop.eup %1083 }
 0x736   :  { %v801_v28 = vadd.f32 1.0, %v1084_v25 }
 0x738   :  { %v803_v29 = vmul.f32 %v801_v28, %v787_v27 }
 0x73a   :  { %v804_v30 = vpack.c.bf16 %v803_v29, %v802_v2 }
 0x73c   :  { %881 = vmatmul.bf16.vlgmr.msrb.gmra.mxu2 %v804_v30 }
 0x7bf   :  { %v882_v32 = vpop.f32.mrf.mxu2 }
 0x7c0   :  { %v883_v33 = vadd.f32 %v1038_v31, %v882_v32 }
 0x7c2   :  { %v887_v34 = vadd.f32 %v883_v33, %v1351_v16 }
 0x7c4   :  { %889 = vst.msk [vmem:[#allocation2] sm:$0xff] %vm50_vm0, %v887_v34 }
 0x7c7   :  { %v884_v35 = vpop.f32.mrf.mxu2 }
 0x7c8   :  { %v885_v36 = vadd.f32 %v1038_v31, %v884_v35 }
 0x7ca   :  { %v888_v37 = vadd.f32 %v885_v36, %v1356_v20 }
 0x7cc   :  { %890 = vst.msk [vmem:[#allocation2 + $0x8] sm:$0xff] %vm50_vm0, %v888_v37 }
 0x7cd   :  { %903 = dma.vmem_to_hbm [thread:$0]  %s896_s17, 256, %s898_s9, [#allocation3], %s1128_s12, %s1128_s12, %s1124_s28  }
 0x7ce   :  { %1109 = dma.done.wait [#allocation3], 256  }
 0x7cf   :  { %1110 = vsyncadd [#allocation3], 4294967040 }
 0x7d0   :  { %908 = vsyncpa [#allocation3], 1 }

</bundles_post_ra>
